<compile_context>
chip_gen: v7x
topology: tpu7x:2x2x1
jax: 0.10.0
libtpu: 0.0.40
codegen_flags: <defaults>
</compile_context>

<pallas_src>
import functools

import jax
import jax.numpy as jnp
from jax.experimental import pallas as pl
from jax.experimental.pallas import tpu as pltpu

STATE_SIZE = 4
ACTION_SIZE = 2
HIDDEN = 64
K_AUG = 8            # fc1 contraction depth after packing [w1 | b1 | 0-pad]
DEFAULT_TILE_B = 8192


def qnet_kernel(x_ref, w1_ref, w2_ref, b2_ref, w3_ref, b3_ref, o_ref):
    # fc1 (+bias folded into the matmul via the ones row) -> relu -> bf16.
    # f32 x f32, K=8 matmul: negligible MXU cost, removes all fc1 VPU passes.
    h1 = jnp.dot(w1_ref[...], x_ref[...],
                 preferred_element_type=jnp.float32)                 # [64, TB]
    h1 = jnp.maximum(h1, 0.0).astype(jnp.bfloat16)

    # fc2: bf16 MXU matmul, f32 accumulate; bias + relu + cast fused.
    h2 = jnp.dot(w2_ref[...], h1, preferred_element_type=jnp.float32)
    h2 = jnp.maximum(h2 + b2_ref[...], 0.0).astype(jnp.bfloat16)

    # fc3 (no activation): lane-dense [2, TB] f32 output tile.
    o = jnp.dot(w3_ref[...], h2, preferred_element_type=jnp.float32)
    o_ref[...] = (o + b3_ref[...]).astype(o_ref.dtype)


def _round_up(n, m):
    return ((n + m - 1) // m) * m


def _qnetwork_forward_impl(x, params, tile_b):
    """x: [B, STATE_SIZE] f32 -> [B, ACTION_SIZE] f32."""
    w1, b1, w2, b2, w3, b3 = params
    B = x.shape[0]

    # Lane-dense padded batch; ensure >=2 tiles when possible (v7x: 2 TCs).
    b_pad = _round_up(max(B, 1), 128)
    tile = min(tile_b, b_pad)
    if b_pad >= 256:
        tile = min(tile, b_pad // 2)
    tile = _round_up(tile, 128)
    b_pad = _round_up(b_pad, tile)
    num_tiles = b_pad // tile

    # Augmented, lane-major x: rows 0-3 = x.T, row 4 = ones (bias), rows 5-7 = 0.
    ones = jnp.ones((1, B), jnp.float32)
    zeros = jnp.zeros((K_AUG - STATE_SIZE - 1, B), jnp.float32)
    x_aug = jnp.concatenate([x.T.astype(jnp.float32), ones, zeros], axis=0)
    x_aug = jnp.pad(x_aug, ((0, 0), (0, b_pad - B)))                 # [8, b_pad]

    # Stationary operands: fc1 weight+bias packed [64, 8] f32; fc2/fc3 in bf16.
    w1_aug = jnp.concatenate(
        [w1, b1, jnp.zeros((HIDDEN, K_AUG - STATE_SIZE - 1), w1.dtype)], axis=1)
    w2b = w2.astype(jnp.bfloat16)
    w3b = w3.astype(jnp.bfloat16)

    out_t = pl.pallas_call(
        qnet_kernel,
        out_shape=jax.ShapeDtypeStruct((ACTION_SIZE, b_pad), jnp.float32),
        grid_spec=pltpu.PrefetchScalarGridSpec(
            num_scalar_prefetch=0,
            grid=(num_tiles,),
            in_specs=[
                # streamed per batch tile (double-buffered by Pallas)
                pl.BlockSpec((K_AUG, tile), lambda i: (0, i)),
                # weights/biases: constant block index -> VMEM-resident
                pl.BlockSpec(w1_aug.shape, lambda i: (0, 0)),
                pl.BlockSpec(w2b.shape, lambda i: (0, 0)),
                pl.BlockSpec(b2.shape, lambda i: (0, 0)),
                pl.BlockSpec(w3b.shape, lambda i: (0, 0)),
                pl.BlockSpec(b3.shape, lambda i: (0, 0)),
            ],
            out_specs=pl.BlockSpec((ACTION_SIZE, tile), lambda i: (0, i)),
        ),
        compiler_params=pltpu.CompilerParams(
            dimension_semantics=("parallel",),
        ),
    )(x_aug, w1_aug, w2b, b2, w3b, b3)

    return out_t[:, :B].T


@jax.jit
def qnetwork_forward(x, params):
    return _qnetwork_forward_impl(x, params, tile_b=DEFAULT_TILE_B)


def init_params(key):
    """Deterministic init mimicking torch.nn.Linear default (U[-1/sqrt(fan_in), +]).

    Weights are stored PyTorch-style [out_features, in_features]; biases are
    [out_features, 1] so they broadcast along the lane (batch) axis in-kernel.
    """
    ks = jax.random.split(key, 6)

    def uniform(k, shape, fan_in):
        bound = 1.0 / jnp.sqrt(float(fan_in))
        return jax.random.uniform(k, shape, jnp.float32, -bound, bound)

    w1 = uniform(ks[0], (HIDDEN, STATE_SIZE), STATE_SIZE)
    b1 = uniform(ks[1], (HIDDEN, 1), STATE_SIZE)
    w2 = uniform(ks[2], (HIDDEN, HIDDEN), HIDDEN)
    b2 = uniform(ks[3], (HIDDEN, 1), HIDDEN)
    w3 = uniform(ks[4], (ACTION_SIZE, HIDDEN), HIDDEN)
    b3 = uniform(ks[5], (ACTION_SIZE, 1), HIDDEN)
    return (w1, b1, w2, b2, w3, b3)


def reference_forward(x, params):
    """Pure-JAX reference mirroring the kernel's numerics:
    fc1 in f32 (bias exact), h1/h2 and w2/w3 bf16-rounded, f32 accumulation."""
    w1, b1, w2, b2, w3, b3 = params
    hp = jax.lax.Precision.HIGHEST

    def q(a):
        return a.astype(jnp.bfloat16).astype(jnp.float32)

    h1 = jnp.maximum(jnp.dot(x, w1.T, precision=hp) + b1.T, 0.0)
    h2 = jnp.maximum(jnp.dot(q(h1), q(w2).T, precision=hp) + b2.T, 0.0)
    return jnp.dot(q(h2), q(w3).T, precision=hp) + b3.T


if __name__ == "__main__":
    key = jax.random.PRNGKey(0)
    pkey, xkey = jax.random.split(key)
    params = init_params(pkey)

    # Small deterministic example.
    batch = 8
    x = jax.random.normal(xkey, (batch, STATE_SIZE), jnp.float32)
    out = jax.block_until_ready(qnetwork_forward(x, params))
    ref = reference_forward(x, params)
    assert out.shape == (batch, ACTION_SIZE)
    assert jnp.allclose(out, ref, atol=2e-2, rtol=2e-2)

    # Exercise the padded / multi-tile path (>=2 tiles -> both v7x TCs).
    x2 = jax.random.normal(jax.random.PRNGKey(1), (384, STATE_SIZE), jnp.float32)
    out2 = jax.block_until_ready(qnetwork_forward(x2, params))
    ref2 = reference_forward(x2, params)
    assert out2.shape == (384, ACTION_SIZE)
    assert jnp.allclose(out2, ref2, atol=2e-2, rtol=2e-2)

    print("KERNEL_OK")
</pallas_src>

<mosaic_0001>
module attributes {stable_mosaic.version = 11 : i64} {
  func.func @qnet_kernel(%arg0: i32, %arg1: memref<8x128xf32, #tpu.memory_space<vmem>>, %arg2: memref<64x8xf32, #tpu.memory_space<vmem>>, %arg3: memref<64x64xbf16, #tpu.memory_space<vmem>>, %arg4: memref<64x1xf32, #tpu.memory_space<vmem>>, %arg5: memref<2x64xbf16, #tpu.memory_space<vmem>>, %arg6: memref<2x1xf32, #tpu.memory_space<vmem>>, %arg7: memref<2x128xf32, #tpu.memory_space<vmem>>) attributes {dimension_semantics = [#tpu.dimension_semantics<parallel>], iteration_bounds = array<i64: 1>, scalar_prefetch = 0 : i64, scratch_operands = 0 : i64, tpu.core_type = #tpu.core_type<tc>, window_params = [{transform_indices = @transform_0, window_bounds = array<i64: 8, 128>}, {pipeline_mode = #tpu.pipeline_mode<synchronous>, transform_indices = @transform_1, window_bounds = array<i64: 64, 8>}, {pipeline_mode = #tpu.pipeline_mode<synchronous>, transform_indices = @transform_2, window_bounds = array<i64: 64, 64>}, {pipeline_mode = #tpu.pipeline_mode<synchronous>, transform_indices = @transform_3, window_bounds = array<i64: 64, 1>}, {pipeline_mode = #tpu.pipeline_mode<synchronous>, transform_indices = @transform_4, window_bounds = array<i64: 2, 64>}, {pipeline_mode = #tpu.pipeline_mode<synchronous>, transform_indices = @transform_5, window_bounds = array<i64: 2, 1>}, {transform_indices = @transform_6, window_bounds = array<i64: 2, 128>}]} {
    %c0 = arith.constant 0 : index
    %c0_0 = arith.constant 0 : index
    %0 = vector.load %arg2[%c0, %c0_0] : memref<64x8xf32, #tpu.memory_space<vmem>>, vector<64x8xf32>
    %c0_1 = arith.constant 0 : index
    %c0_2 = arith.constant 0 : index
    %1 = vector.load %arg1[%c0_1, %c0_2] : memref<8x128xf32, #tpu.memory_space<vmem>>, vector<8x128xf32>
    %cst = arith.constant dense<0.000000e+00> : vector<64x128xf32>
    %2 = tpu.matmul %0, %1, %cst {dimension_numbers = #tpu.dot_dimension_numbers<[1], [0], [0], [1], [0, 0, 1, 1], [], []>} : vector<64x8xf32>, vector<8x128xf32>, vector<64x128xf32> -> vector<64x128xf32>
    %cst_3 = arith.constant 0.000000e+00 : f32
    %3 = vector.broadcast %cst_3 : f32 to vector<64x128xf32>
    %4 = arith.maximumf %2, %3 : vector<64x128xf32>
    %5 = arith.truncf %4 : vector<64x128xf32> to vector<64x128xbf16>
    %c0_4 = arith.constant 0 : index
    %c0_5 = arith.constant 0 : index
    %6 = vector.load %arg3[%c0_4, %c0_5] : memref<64x64xbf16, #tpu.memory_space<vmem>>, vector<64x64xbf16>
    %cst_6 = arith.constant dense<0.000000e+00> : vector<64x128xf32>
    %7 = tpu.matmul %6, %5, %cst_6 {dimension_numbers = #tpu.dot_dimension_numbers<[1], [0], [0], [1], [0, 0, 1, 1], [], []>} : vector<64x64xbf16>, vector<64x128xbf16>, vector<64x128xf32> -> vector<64x128xf32>
    %c0_7 = arith.constant 0 : index
    %c0_8 = arith.constant 0 : index
    %8 = vector.load %arg4[%c0_7, %c0_8] : memref<64x1xf32, #tpu.memory_space<vmem>>, vector<64x1xf32>
    %9 = vector.broadcast %8 : vector<64x1xf32> to vector<64x128xf32>
    %10 = arith.addf %7, %9 : vector<64x128xf32>
    %cst_9 = arith.constant 0.000000e+00 : f32
    %11 = vector.broadcast %cst_9 : f32 to vector<64x128xf32>
    %12 = arith.maximumf %10, %11 : vector<64x128xf32>
    %13 = arith.truncf %12 : vector<64x128xf32> to vector<64x128xbf16>
    %c0_10 = arith.constant 0 : index
    %c0_11 = arith.constant 0 : index
    %14 = vector.load %arg5[%c0_10, %c0_11] : memref<2x64xbf16, #tpu.memory_space<vmem>>, vector<2x64xbf16>
    %cst_12 = arith.constant dense<0.000000e+00> : vector<2x128xf32>
    %15 = tpu.matmul %14, %13, %cst_12 {dimension_numbers = #tpu.dot_dimension_numbers<[1], [0], [0], [1], [0, 0, 1, 1], [], []>} : vector<2x64xbf16>, vector<64x128xbf16>, vector<2x128xf32> -> vector<2x128xf32>
    %c0_13 = arith.constant 0 : index
    %c0_14 = arith.constant 0 : index
    %16 = vector.load %arg6[%c0_13, %c0_14] : memref<2x1xf32, #tpu.memory_space<vmem>>, vector<2x1xf32>
    %17 = vector.broadcast %16 : vector<2x1xf32> to vector<2x128xf32>
    %18 = arith.addf %15, %17 : vector<2x128xf32>
    %c0_15 = arith.constant 0 : index
    %c0_16 = arith.constant 0 : index
    %19 = vector.load %arg7[%c0_15, %c0_16] : memref<2x128xf32, #tpu.memory_space<vmem>>, vector<2x128xf32>
    tpu.vector_store %arg7[%c0_15, %c0_16], %18 {strides = array<i32>} : memref<2x128xf32, #tpu.memory_space<vmem>>, vector<2x128xf32>,
    return
  }
  func.func @transform_0(%arg0: i32) -> (i32, i32) {
    %c0_i32 = arith.constant 0 : i32
    %c0_i32_0 = arith.constant 0 : i32
    return %c0_i32, %arg0 : i32, i32
  }
  func.func @transform_1(%arg0: i32) -> (i32, i32) {
    %c0_i32 = arith.constant 0 : i32
    %c0_i32_0 = arith.constant 0 : i32
    %c0_i32_1 = arith.constant 0 : i32
    return %c0_i32, %c0_i32_0 : i32, i32
  }
  func.func @transform_2(%arg0: i32) -> (i32, i32) {
    %c0_i32 = arith.constant 0 : i32
    %c0_i32_0 = arith.constant 0 : i32
    %c0_i32_1 = arith.constant 0 : i32
    return %c0_i32, %c0_i32_0 : i32, i32
  }
  func.func @transform_3(%arg0: i32) -> (i32, i32) {
    %c0_i32 = arith.constant 0 : i32
    %c0_i32_0 = arith.constant 0 : i32
    %c0_i32_1 = arith.constant 0 : i32
    return %c0_i32, %c0_i32_0 : i32, i32
  }
  func.func @transform_4(%arg0: i32) -> (i32, i32) {
    %c0_i32 = arith.constant 0 : i32
    %c0_i32_0 = arith.constant 0 : i32
    %c0_i32_1 = arith.constant 0 : i32
    return %c0_i32, %c0_i32_0 : i32, i32
  }
  func.func @transform_5(%arg0: i32) -> (i32, i32) {
    %c0_i32 = arith.constant 0 : i32
    %c0_i32_0 = arith.constant 0 : i32
    %c0_i32_1 = arith.constant 0 : i32
    return %c0_i32, %c0_i32_0 : i32, i32
  }
  func.func @transform_6(%arg0: i32) -> (i32, i32) {
    %c0_i32 = arith.constant 0 : i32
    %c0_i32_0 = arith.constant 0 : i32
    return %c0_i32, %arg0 : i32, i32
  }
}

</mosaic_0001>

<bundles_post_ra>
// kernel: qnetwork_forward.1
= control target key start
LH: loop header
LB: loop body
LE: loop exit
PB: predicated region body
PF: predicated region fallthrough
CT: control target
= control target key end

     0   :  { %vm33_vm0 = vcmask 64512   ;;  %vm251_vm1 = vcmask 523264   ;;  %v486_v10 = vmov 0   ;;  %v487_v43 = vmov 0.0   ;;  %s609_s0 = inlined_call_operand.vmem [shape: f32[8,128], index: 0, kind: input, shape index: {}]   ;;  %s610_s1 = inlined_call_operand.vmem [shape: f32[64,8], index: 1, kind: input, shape index: {}]   ;;  %s611_s2 = inlined_call_operand.vmem [shape: bf16[64,64], index: 2, kind: input, shape index: {}]   ;;  %s612_s3 = inlined_call_operand.vmem [shape: f32[64,1], index: 3, kind: input, shape index: {}]   ;;  %s613_s5 = inlined_call_operand.vmem [shape: f32[2,1], index: 5, kind: input, shape index: {}]   ;;  %s614_s4 = inlined_call_operand.vmem [shape: bf16[2,64], index: 4, kind: input, shape index: {}]   ;;  %s615_s6 = inlined_call_operand.vmem [shape: f32[2,128], index: 6, kind: output, shape index: {}]  }
   0x1   :  { %v32_v0 = vld [vmem:[%s609_s0] sm:$0xff]  ;;  %v25_v2 = vld [vmem:[%s610_s1 + $0x8] sm:$0xff]  ;;  %v26_v3 = vld [vmem:[%s610_s1 + $0x10] sm:$0xff]  ;;  %480 = vset.pattern.permute.xlu0 %v486_v10  ;;  %481 = vset.pattern.permute.xlu1 %v486_v10  ;;  %vm488_vm2 = vmmov 0  }
   0x2   :  { %v24_v1 = vld [vmem:[%s610_s1] sm:$0xff]  ;;  %435 = vmatprep.subr.mxu0 %v32_v0  ;;  %v27_v4 = vld [vmem:[%s610_s1 + $0x18] sm:$0xff]  ;;  %v29_v6 = vld [vmem:[%s610_s1 + $0x28] sm:$0xff] }
   0x3   :  { %437 = vmatprep.mubr.msk.f32.mxu0 %vm33_vm0, %v24_v1  ;;  %436 = vmatpush3.msra.mxu0 %v32_v0  ;;  %v28_v5 = vld [vmem:[%s610_s1 + $0x20] sm:$0xff]  ;;  %v30_v7 = vld [vmem:[%s610_s1 + $0x30] sm:$0xff]  ;;  %v31_v8 = vld [vmem:[%s610_s1 + $0x38] sm:$0xff] }
   0x4   :  { %438 = vmatmul.mubr.msk.f32.vlgmr.msra.gmra.mrb[0].mxu0 %vm33_vm0, %v25_v2  ;;  %v482_v9 = vld [vmem:[%s611_s2] sm:$0xff]   ;;  %v185_v12 = vld [vmem:[%s612_s3 + $0x10] sm:$0xff]  ;;  %v184_v13 = vld [vmem:[%s612_s3 + $0x8] sm:$0xff]  ;;  %465 = vmatprep.subr.bf16.mxu0 %v487_v43 }
   0x5   :  { %440 = vmatprep.mubr.msk.f32.mxu0 %vm33_vm0, %v26_v3  ;;  %457 = vmatprep.mubr.msk.bf16.mxu1 %vm251_vm1, %v482_v9  ;;  %v183_v11 = vld [vmem:[%s612_s3] sm:$0xff]  ;;  %v186_v14 = vld [vmem:[%s612_s3 + $0x18] sm:$0xff]  ;;  %v188_v16 = vld [vmem:[%s612_s3 + $0x28] sm:$0xff] }
   0x6   :  { %193 = vperm.xlu0 %480, %v183_v11   ;;  %203 = vperm.xlu1 %481, %v185_v12   ;;  %v187_v15 = vld [vmem:[%s612_s3 + $0x20] sm:$0xff]  ;;  %v189_v17 = vld [vmem:[%s612_s3 + $0x30] sm:$0xff]  ;;  %v190_v18 = vld [vmem:[%s612_s3 + $0x38] sm:$0xff] }
   0x7   :  { %v342_v19 = vld [vmem:[%s613_s5] sm:$0x3]  ;;  %v483_v40 = vld [vmem:[%s611_s2 + $0x8] sm:$0xff]   ;;  %v484_v41 = vld [vmem:[%s611_s2 + $0x10] sm:$0xff]  }
   0x8   :  { %441 = vmatmul.mubr.msk.f32.gmra.mrb[2].mxu0 %vm33_vm0, %v27_v4  ;;  %v485_v42 = vld [vmem:[%s611_s2 + $0x18] sm:$0xff]  }
   0x9   :  { %443 = vmatprep.mubr.msk.f32.mxu0 %vm33_vm0, %v28_v5 }
   0xa   :  { %198 = vperm.xlu0 %480, %v184_v13   ;;  %208 = vperm.xlu1 %481, %v186_v14  }
   0xc   :  { %444 = vmatmul.mubr.msk.f32.gmra.mrb[4].mxu0 %vm33_vm0, %v29_v6 }
   0xd   :  { %446 = vmatprep.mubr.msk.f32.mxu0 %vm33_vm0, %v30_v7 }
   0xe   :  { %213 = vperm.xlu0 %480, %v187_v15   ;;  %218 = vperm.xlu1 %481, %v188_v16   ;;  %v341_v16 = vld [vmem:[%s614_s4] sm:$0x1] }
  0x10   :  { %447 = vmatmul.mubr.msk.f32.gmra.mrb[6].mxu0 %vm33_vm0, %v31_v8 }
  0x11   :  { %473 = vmatprep.mubr.msk.bf16.mxu0 %vm488_vm2, %v487_v43 }
  0x12   :  { %223 = vperm.xlu0 %480, %v189_v17   ;;  %228 = vperm.xlu1 %481, %v190_v18  }
  0x16   :  { %345 = vperm.xlu0 %480, %v342_v19  }
  0x85   :  { %v194_v44 = vpop.permute.xlu0 %193  ;;  %v204_v45 = vpop.permute.xlu1 %203 }
  0x89   :  { %v199_v46 = vpop.permute.xlu0 %198  ;;  %v209_v47 = vpop.permute.xlu1 %208 }
  0x8d   :  { %v214_v51 = vpop.permute.xlu0 %213  ;;  %v219_v56 = vpop.permute.xlu1 %218 }
  0x91   :  { %v224_v63 = vpop.permute.xlu0 %223  ;;  %v229_v4 = vpop.permute.xlu1 %228 }
  0x95   :  { %v346_v17 = vpop.permute.xlu0 %345 }
  0xd7   :  { %v439_v20 = vpop.f32.mrb[0].mxu0 }
  0xd8   :  { %v164_v21 = vmax.f32 %v439_v20, 0.0  ;;  %v124_v22 = vpop.f32.mrb[1].mxu0 }
  0xd9   :  { %v163_v23 = vmax.f32 %v124_v22, 0.0 }
  0xdb   :  { %v442_v24 = vpop.f32.mrb[2].mxu0  ;;  %v171_v25 = vpack.c.bf16 %v164_v21, %v163_v23 }
  0xdc   :  { %v166_v26 = vmax.f32 %v442_v24, 0.0  ;;  %v134_v27 = vpop.f32.mrb[3].mxu0 }
  0xdd   :  { %v165_v28 = vmax.f32 %v134_v27, 0.0  ;;  %449 = vmatprep.subr.bf16.mxu1 %v171_v25 }
  0xde   :  { %450 = vmatpush3.bf16.msra.mxu1 %v171_v25 }
  0xdf   :  { %v172_v29 = vpack.c.bf16 %v166_v26, %v165_v28  ;;  %v445_v30 = vpop.f32.mrb[4].mxu0 }
  0xe0   :  { %v168_v31 = vmax.f32 %v445_v30, 0.0  ;;  %v144_v32 = vpop.f32.mrb[5].mxu0 }
  0xe1   :  { %v167_v33 = vmax.f32 %v144_v32, 0.0  ;;  %451 = vmatprep.subr.bf16.mxu1 %v172_v29 }
  0xe2   :  { %452 = vmatpush3.bf16.msra.mxu1 %v172_v29 }
  0xe3   :  { %v173_v34 = vpack.c.bf16 %v168_v31, %v167_v33  ;;  %v448_v35 = vpop.f32.mrb[6].mxu0 }
  0xe4   :  { %v170_v36 = vmax.f32 %v448_v35, 0.0  ;;  %v154_v37 = vpop.f32.mrb[7].mxu0 }
  0xe5   :  { %v169_v38 = vmax.f32 %v154_v37, 0.0  ;;  %453 = vmatprep.subr.bf16.mxu1 %v173_v34 }
  0xe6   :  { %454 = vmatpush3.bf16.msra.mxu1 %v173_v34 }
  0xe7   :  { %v174_v39 = vpack.c.bf16 %v170_v36, %v169_v38 }
  0xe9   :  { %455 = vmatprep.subr.bf16.mxu1 %v174_v39 }
  0xea   :  { %456 = vmatpush3.bf16.msra.mxu1 %v174_v39 }
  0xed   :  { %458 = vmatmul.mubr.msk.bf16.vlgmr.msra.gmra.mrb[0].mxu1 %vm251_vm1, %v483_v40 }
  0xee   :  { %461 = vmatprep.mubr.msk.bf16.mxu1 %vm251_vm1, %v484_v41 }
  0xf5   :  { %462 = vmatmul.mubr.msk.bf16.gmra.mrb[4].mxu1 %vm251_vm1, %v485_v42 }
 0x1c0   :  { %v459_v48 = vpop.f32.mrb[0].mxu1 }
 0x1c1   :  { %v307_v49 = vadd.f32 %v459_v48, %v204_v45  ;;  %v298_v50 = vpop.f32.mrb[1].mxu1 }
 0x1c2   :  { %v299_v52 = vadd.f32 %v298_v50, %v194_v44  ;;  %v460_v53 = vpop.f32.mrb[2].mxu1 }
 0x1c3   :  { %v310_v54 = vadd.f32 %v460_v53, %v209_v47  ;;  %v301_v55 = vpop.f32.mrb[3].mxu1  ;;  %v331_v58 = vmax.f32 %v307_v49, 0.0 }
 0x1c4   :  { %v302_v57 = vadd.f32 %v301_v55, %v199_v46  ;;  %v329_v60 = vmax.f32 %v299_v52, 0.0 }
 0x1c5   :  { %v332_v59 = vmax.f32 %v310_v54, 0.0 }
 0x1c6   :  { %v330_v61 = vmax.f32 %v302_v57, 0.0 }
 0x1c7   :  { %v338_v62 = vpack.c.bf16 %v332_v59, %v331_v58 }
 0x1c8   :  { %v337_v0 = vpack.c.bf16 %v330_v61, %v329_v60  ;;  %v463_v1 = vpop.f32.mrb[4].mxu1 }
 0x1c9   :  { %v323_v2 = vadd.f32 %v463_v1, %v224_v63  ;;  %v314_v3 = vpop.f32.mrb[5].mxu1 }
 0x1ca   :  { %v315_v5 = vadd.f32 %v314_v3, %v214_v51  ;;  %v464_v6 = vpop.f32.mrb[6].mxu1  ;;  %466 = vmatpush3.bf16.msra.mxu0 %v337_v0 }
 0x1cb   :  { %v326_v7 = vadd.f32 %v464_v6, %v229_v4  ;;  %v317_v8 = vpop.f32.mrb[7].mxu1  ;;  %467 = vmatprep.subr.bf16.mxu0 %v487_v43  ;;  %v335_v10 = vmax.f32 %v323_v2, 0.0 }
 0x1cc   :  { %v318_v9 = vadd.f32 %v317_v8, %v219_v56  ;;  %v333_v12 = vmax.f32 %v315_v5, 0.0 }
 0x1cd   :  { %v336_v11 = vmax.f32 %v326_v7, 0.0 }
 0x1ce   :  { %v334_v13 = vmax.f32 %v318_v9, 0.0  ;;  %468 = vmatpush3.bf16.msra.mxu0 %v338_v62 }
 0x1cf   :  { %v340_v14 = vpack.c.bf16 %v336_v11, %v335_v10  ;;  %469 = vmatprep.subr.bf16.mxu0 %v487_v43 }
 0x1d0   :  { %v339_v15 = vpack.c.bf16 %v334_v13, %v333_v12 }
 0x1d2   :  { %470 = vmatpush3.bf16.msra.mxu0 %v339_v15 }
 0x1d3   :  { %471 = vmatprep.subr.bf16.mxu0 %v487_v43 }
 0x1d6   :  { %472 = vmatpush3.bf16.msra.mxu0 %v340_v14 }
 0x1d9   :  { %474 = vmatmul.mubr.msk.bf16.vlgmr.msra.gmra.mrb[8].mxu0 %vm251_vm1, %v341_v16 }
 0x2ac   :  { %v385_v18 = vpop.f32.mrb[8].mxu0 }
 0x2ad   :  { %v386_v19 = vadd.f32 %v385_v18, %v346_v17  ;;  %v475_v20 = vpop.f32.mrb[9].mxu0 }
 0x2ae   :  { %v388_v21 = vpop.f32.mrb[10].mxu0 }
 0x2af   :  { %391 = vst [vmem:[%s615_s6] sm:$0x3] %v386_v19  ;;  %v476_v22 = vpop.f32.mrb[11].mxu0 }

</bundles_post_ra>
